<compile_context>
chip_gen: v6e
topology: v6e:2x2x1
jax: 0.10.0
libtpu: 0.0.40
codegen_flags: <defaults>
</compile_context>

<pallas_src>
import jax
import jax.numpy as jnp
from jax.experimental import pallas as pl
from jax.experimental.pallas import tpu as pltpu

K = 3        # conv kernel size
STRIDE = 2   # conv stride
POOL = 2     # maxpool kernel == stride
LANE = 128   # lane width


def _conv_out_len(l):
    return (l - K) // STRIDE + 1


def _pool_out_len(l):
    return (l - POOL) // POOL + 1


def model_kernel(params_ref, xe_ref, xo_ref, o_ref):
    # params_ref: SMEM (8,) = [w1_0, w1_1, w1_2, w2_0, w2_1, w2_2, b1, b2]
    # xe_ref:     VMEM (L1+1, TN)  even rows of x: x[0], x[2], ..., x[2*L1]
    # xo_ref:     VMEM (L1,   TN)  odd  rows of x: x[1], x[3], ..., x[2*L1-1]
    # o_ref:      VMEM (L3,   TN)
    w10, w11, w12 = params_ref[0], params_ref[1], params_ref[2]
    w20, w21, w22 = params_ref[3], params_ref[4], params_ref[5]
    b1, b2 = params_ref[6], params_ref[7]

    L1 = xo_ref.shape[0]
    xe = xe_ref[...]                 # (L1+1, TN)
    xo = xo_ref[...]                 # (L1,   TN)

    # conv1 (stride 2) + bias + ReLU: c[j] = w1 . x[2j:2j+3].
    # All three taps are contiguous sublane slabs (no strided access).
    c = w10 * xe[:L1, :] + w11 * xo + w12 * xe[1:, :]
    d = jnp.maximum(c + b1, 0.0)                                    # (L1, TN)

    # conv2 computed at stride 1 over contiguous shifted slabs; the stride-2
    # sampling + MaxPool1d(2) fuse into b[p] = max(e1[4p], e1[4p+2]) + b2
    # (the bias is uniform per position, so it commutes with the max).
    e1 = w20 * d[:-2, :] + w21 * d[1:-1, :] + w22 * d[2:, :]        # (L1-2, TN)

    L3 = o_ref.shape[0]
    rows = [jnp.maximum(e1[4 * p:4 * p + 1, :], e1[4 * p + 2:4 * p + 3, :])
            for p in range(L3)]
    o_ref[...] = jnp.concatenate(rows, axis=0) + b2


def _pick_tiling(n):
    # Pad the batch (lane axis) to a multiple of 128 and pick a large lane
    # tile: >=512 columns per step once the batch is big enough (small tiles
    # leave ~0.35us/step overhead dominating), while keeping >=2 grid steps
    # when possible so the "parallel" axis can shard across v7x's two TCs.
    n_pad = -(-max(n, 1) // LANE) * LANE
    if n_pad >= 1024:
        n_pad = -(-n_pad // 512) * 512
    tn = LANE
    for cand in (2048, 1024, 512, 256, 128):
        if n_pad % cand == 0:
            tn = cand
            break
    if tn == n_pad and n_pad >= 2 * LANE:
        tn //= 2
    return n_pad, tn


def model_forward(x_ncl, w1, b1, w2, b2):
    N, C, L = x_ncl.shape
    assert C == 1, "model has a single input/output channel"
    L1 = _conv_out_len(L)
    L2 = _conv_out_len(L1)
    L3 = _pool_out_len(L2)
    assert L3 >= 1, "input too short for conv->conv->maxpool chain"

    # All weight/bias scalars packed into one SMEM vector.
    params = jnp.concatenate([
        jnp.asarray(w1, jnp.float32).reshape(-1),
        jnp.asarray(w2, jnp.float32).reshape(-1),
        jnp.asarray(b1, jnp.float32).reshape(-1),
        jnp.asarray(b2, jnp.float32).reshape(-1),
    ])                                                              # (8,)

    # Transposed layout: (L, N) with batch on lanes; pad batch to the tiling.
    n_pad, tn = _pick_tiling(N)
    x_ln = x_ncl.reshape(N, L).astype(jnp.float32).T                # (L, N)
    if n_pad != N:
        x_ln = jnp.pad(x_ln, ((0, 0), (0, n_pad - N)))

    # Even/odd sublane pre-split (done once by XLA in HBM) so the kernel's
    # stride-2 conv1 reads only contiguous sublane slabs.
    xe = x_ln[0:2 * L1 + 1:2, :]                                    # (L1+1, n_pad)
    xo = x_ln[1:2 * L1:2, :]                                        # (L1,   n_pad)

    out = pl.pallas_call(
        model_kernel,
        out_shape=jax.ShapeDtypeStruct((L3, n_pad), jnp.float32),
        grid=(n_pad // tn,),
        in_specs=[
            pl.BlockSpec(memory_space=pltpu.MemorySpace.SMEM),      # params (8,)
            pl.BlockSpec((L1 + 1, tn), lambda i: (0, i)),           # xe tile
            pl.BlockSpec((L1, tn), lambda i: (0, i)),               # xo tile
        ],
        out_specs=pl.BlockSpec((L3, tn), lambda i: (0, i)),
        compiler_params=pltpu.CompilerParams(
            dimension_semantics=("parallel",)),
    )(params, xe, xo)

    # Drop batch padding (padded columns carry ReLU(b1) garbage) and restore
    # the torch (N, 1, L_out) layout.
    return out[:, :N].T.reshape(N, 1, L3)


def _reference(x_ncl, w1, b1, w2, b2):
    # Pure-JAX reference for a sanity check.
    def conv(v, w, b):
        w = jnp.asarray(w).reshape(-1)
        b = jnp.asarray(b).reshape(-1)
        lo = _conv_out_len(v.shape[-1])
        cols = [
            (v[..., STRIDE * j: STRIDE * j + K] * w).sum(-1) + b[0]
            for j in range(lo)
        ]
        return jnp.stack(cols, axis=-1)

    c = conv(x_ncl[:, 0, :], w1, b1)
    d = jnp.maximum(c, 0.0)
    e = conv(d, w2, b2)
    lo = _pool_out_len(e.shape[-1])
    pooled = jnp.maximum(e[..., 0:POOL * lo:POOL], e[..., 1:POOL * lo:POOL])
    return pooled[:, None, :]


if __name__ == "__main__":
    key = jax.random.PRNGKey(0)
    kx, kw, kb = jax.random.split(key, 3)

    N, C, L = 2, 1, 31
    x = jax.random.normal(kx, (N, C, L), dtype=jnp.float32)

    # Conv1d(1,1,3): weight (1,1,3), bias (1,). torch.manual_seed(3) is used
    # for both convs, so conv1 and conv2 share identical parameters -> reuse
    # the same deterministic init for both.
    bound = 1.0 / jnp.sqrt(3.0)  # 1/sqrt(fan_in), fan_in = C_in * K = 3
    w = jax.random.uniform(kw, (K,), jnp.float32, minval=-bound, maxval=bound)
    b = jax.random.uniform(kb, (1,), jnp.float32, minval=-bound, maxval=bound)
    w1, b1 = w, b
    w2, b2 = w, b

    out = jax.block_until_ready(model_forward(x, w1, b1, w2, b2))

    ref = _reference(x, w1, b1, w2, b2)
    L3 = _pool_out_len(_conv_out_len(_conv_out_len(L)))
    assert out.shape == ref.shape == (N, 1, L3)
    assert jnp.allclose(out, ref, atol=1e-5, rtol=1e-5), (out, ref)

    print("KERNEL_OK")
</pallas_src>

<mosaic_0001>
module attributes {stable_mosaic.version = 11 : i64} {
  func.func @model_kernel(%arg0: i32, %arg1: memref<8xf32, #tpu.memory_space<smem>>, %arg2: memref<16x128xf32, #tpu.memory_space<vmem>>, %arg3: memref<15x128xf32, #tpu.memory_space<vmem>>, %arg4: memref<3x128xf32, #tpu.memory_space<vmem>>) attributes {dimension_semantics = [#tpu.dimension_semantics<parallel>], iteration_bounds = array<i64: 1>, scalar_prefetch = 0 : i64, scratch_operands = 0 : i64, tpu.core_type = #tpu.core_type<tc>, window_params = [{transform_indices = @transform_0, window_bounds = array<i64: 8>}, {transform_indices = @transform_1, window_bounds = array<i64: 16, 128>}, {transform_indices = @transform_2, window_bounds = array<i64: 15, 128>}, {transform_indices = @transform_3, window_bounds = array<i64: 3, 128>}]} {
    %c0 = arith.constant 0 : index
    %0 = memref.load %arg1[%c0] : memref<8xf32, #tpu.memory_space<smem>>
    %c1 = arith.constant 1 : index
    %1 = memref.load %arg1[%c1] : memref<8xf32, #tpu.memory_space<smem>>
    %c2 = arith.constant 2 : index
    %2 = memref.load %arg1[%c2] : memref<8xf32, #tpu.memory_space<smem>>
    %c3 = arith.constant 3 : index
    %3 = memref.load %arg1[%c3] : memref<8xf32, #tpu.memory_space<smem>>
    %c4 = arith.constant 4 : index
    %4 = memref.load %arg1[%c4] : memref<8xf32, #tpu.memory_space<smem>>
    %c5 = arith.constant 5 : index
    %5 = memref.load %arg1[%c5] : memref<8xf32, #tpu.memory_space<smem>>
    %c6 = arith.constant 6 : index
    %6 = memref.load %arg1[%c6] : memref<8xf32, #tpu.memory_space<smem>>
    %c7 = arith.constant 7 : index
    %7 = memref.load %arg1[%c7] : memref<8xf32, #tpu.memory_space<smem>>
    %c0_0 = arith.constant 0 : index
    %c0_1 = arith.constant 0 : index
    %8 = vector.load %arg2[%c0_0, %c0_1] : memref<16x128xf32, #tpu.memory_space<vmem>>, vector<16x128xf32>
    %c0_2 = arith.constant 0 : index
    %c0_3 = arith.constant 0 : index
    %9 = vector.load %arg3[%c0_2, %c0_3] : memref<15x128xf32, #tpu.memory_space<vmem>>, vector<15x128xf32>
    %10 = vector.extract_strided_slice %8 {offsets = [0, 0], sizes = [15, 128], strides = [1, 1]} : vector<16x128xf32> to vector<15x128xf32>
    %11 = vector.broadcast %0 : f32 to vector<15x128xf32>
    %12 = arith.mulf %11, %10 : vector<15x128xf32>
    %13 = vector.broadcast %1 : f32 to vector<15x128xf32>
    %14 = arith.mulf %13, %9 : vector<15x128xf32>
    %15 = arith.addf %12, %14 : vector<15x128xf32>
    %16 = vector.extract_strided_slice %8 {offsets = [1, 0], sizes = [15, 128], strides = [1, 1]} : vector<16x128xf32> to vector<15x128xf32>
    %17 = vector.broadcast %2 : f32 to vector<15x128xf32>
    %18 = arith.mulf %17, %16 : vector<15x128xf32>
    %19 = arith.addf %15, %18 : vector<15x128xf32>
    %20 = vector.broadcast %6 : f32 to vector<15x128xf32>
    %21 = arith.addf %19, %20 : vector<15x128xf32>
    %cst = arith.constant 0.000000e+00 : f32
    %22 = vector.broadcast %cst : f32 to vector<15x128xf32>
    %23 = arith.maximumf %21, %22 : vector<15x128xf32>
    %24 = vector.extract_strided_slice %23 {offsets = [0, 0], sizes = [13, 128], strides = [1, 1]} : vector<15x128xf32> to vector<13x128xf32>
    %25 = vector.broadcast %3 : f32 to vector<13x128xf32>
    %26 = arith.mulf %25, %24 : vector<13x128xf32>
    %27 = vector.extract_strided_slice %23 {offsets = [1, 0], sizes = [13, 128], strides = [1, 1]} : vector<15x128xf32> to vector<13x128xf32>
    %28 = vector.broadcast %4 : f32 to vector<13x128xf32>
    %29 = arith.mulf %28, %27 : vector<13x128xf32>
    %30 = arith.addf %26, %29 : vector<13x128xf32>
    %31 = vector.extract_strided_slice %23 {offsets = [2, 0], sizes = [13, 128], strides = [1, 1]} : vector<15x128xf32> to vector<13x128xf32>
    %32 = vector.broadcast %5 : f32 to vector<13x128xf32>
    %33 = arith.mulf %32, %31 : vector<13x128xf32>
    %34 = arith.addf %30, %33 : vector<13x128xf32>
    %35 = vector.extract_strided_slice %34 {offsets = [0, 0], sizes = [1, 128], strides = [1, 1]} : vector<13x128xf32> to vector<1x128xf32>
    %36 = vector.extract_strided_slice %34 {offsets = [2, 0], sizes = [1, 128], strides = [1, 1]} : vector<13x128xf32> to vector<1x128xf32>
    %37 = arith.maximumf %35, %36 : vector<1x128xf32>
    %38 = vector.extract_strided_slice %34 {offsets = [4, 0], sizes = [1, 128], strides = [1, 1]} : vector<13x128xf32> to vector<1x128xf32>
    %39 = vector.extract_strided_slice %34 {offsets = [6, 0], sizes = [1, 128], strides = [1, 1]} : vector<13x128xf32> to vector<1x128xf32>
    %40 = arith.maximumf %38, %39 : vector<1x128xf32>
    %41 = vector.extract_strided_slice %34 {offsets = [8, 0], sizes = [1, 128], strides = [1, 1]} : vector<13x128xf32> to vector<1x128xf32>
    %42 = vector.extract_strided_slice %34 {offsets = [10, 0], sizes = [1, 128], strides = [1, 1]} : vector<13x128xf32> to vector<1x128xf32>
    %43 = arith.maximumf %41, %42 : vector<1x128xf32>
    %44 = tpu.concatenate %37, %40, %43 in 0 : vector<1x128xf32>, vector<1x128xf32>, vector<1x128xf32> -> vector<3x128xf32>
    %45 = vector.broadcast %7 : f32 to vector<3x128xf32>
    %46 = arith.addf %44, %45 : vector<3x128xf32>
    %c0_4 = arith.constant 0 : index
    %c0_5 = arith.constant 0 : index
    %47 = vector.load %arg4[%c0_4, %c0_5] : memref<3x128xf32, #tpu.memory_space<vmem>>, vector<3x128xf32>
    tpu.vector_store %arg4[%c0_4, %c0_5], %46 {strides = array<i32>} : memref<3x128xf32, #tpu.memory_space<vmem>>, vector<3x128xf32>,
    return
  }
  func.func @transform_0(%arg0: i32) -> i32 {
    %c0_i32 = arith.constant 0 : i32
    %c0_i32_0 = arith.constant 0 : i32
    return %c0_i32 : i32
  }
  func.func @transform_1(%arg0: i32) -> (i32, i32) {
    %c0_i32 = arith.constant 0 : i32
    %c0_i32_0 = arith.constant 0 : i32
    return %c0_i32, %arg0 : i32, i32
  }
  func.func @transform_2(%arg0: i32) -> (i32, i32) {
    %c0_i32 = arith.constant 0 : i32
    %c0_i32_0 = arith.constant 0 : i32
    return %c0_i32, %arg0 : i32, i32
  }
  func.func @transform_3(%arg0: i32) -> (i32, i32) {
    %c0_i32 = arith.constant 0 : i32
    %c0_i32_0 = arith.constant 0 : i32
    return %c0_i32, %arg0 : i32, i32
  }
}

</mosaic_0001>

<bundles_post_ra>
// kernel: tpu_custom_call.1
= control target key start
LH: loop header
LB: loop body
LE: loop exit
PB: predicated region body
PF: predicated region fallthrough
CT: control target
= control target key end

     0   :  { %8 = vsyncpa [#allocation5], 0  ;;  %s290_s0 = inlined_call_operand.hbm [shape: f32[8], index: 0, kind: input, shape index: {}]   ;;  %s291_s1 = inlined_call_operand.hbm [shape: f32[16,128], index: 1, kind: input, shape index: {}]   ;;  %s292_s2 = inlined_call_operand.hbm [shape: f32[15,128], index: 2, kind: input, shape index: {}]   ;;  %s293_s3 = inlined_call_operand.hbm [shape: f32[3,128], index: 3, kind: output, shape index: {}]  }
   0x1   :  { %9 = vsyncpa [#allocation3], 0 }
   0x2   :  { %10 = vsyncpa [#allocation8], 0 }
   0x3   :  { %11 = vsyncpa [#allocation4], 0  ;;  %s247_s12 = smov [#allocation2]   ;;  %s248_s15 = smov [#allocation6]  }
   0x4   :  { %19 = dma.hbm_to_smem %s290_s0, 16, %s247_s12, [#allocation5]  }
   0x5   :  { %s25_s16 = sshll.u32 %s248_s15, 4  ;;  %s26_s16 = int_to_ptr.vmem [resolvable:$true] %s25_s16 }
   0x6   :  { %s187_s17 = scalar_lea.vmem %s26_s16, 256  ;;  %p192_p1 = scmp.lt.s32.totalorder %s26_s16, %s26_s16 }
   0x7   :  { %p188_p0 = scmp.ne.s32.totalorder %s26_s16, %s187_s17  ;;  %p193_p2 = scmp.lt.s32.totalorder %s187_s17, %s187_s17 }
   0x9   :  { %p194_p3 = por %p193_p2, %p192_p1 }
   0xb   :  { %p195_p4 = pnand %p194_p3, %p188_p0 }
   0xd   :  { %198 = shalt.err (!%p195_p4)
}
   0xe   :  { %s249_s18 = smov 128   ;;  %s250_s19 = smov 8  }
   0xf   :  { %31 = dma.hbm_to_vmem [thread:$0]  %s291_s1, 256, %s26_s16, [#allocation3], %s249_s18, %s249_s18, %s250_s19  }
  0x10   :  { %s251_s22 = smov [#allocation7]  }
  0x11   :  { %s37_s23 = sshll.u32 %s251_s22, 4  ;;  %s38_s23 = int_to_ptr.vmem [resolvable:$true] %s37_s23 }
  0x12   :  { %s207_s0 = scalar_lea.vmem %s38_s23, 256  ;;  %p212_p6 = scmp.lt.s32.totalorder %s38_s23, %s38_s23 }
  0x13   :  { %p208_p5 = scmp.ne.s32.totalorder %s38_s23, %s207_s0  ;;  %p213_p7 = scmp.lt.s32.totalorder %s207_s0, %s207_s0 }
  0x15   :  { %p214_p8 = por %p213_p7, %p212_p6 }
  0x17   :  { %p215_p9 = pnand %p214_p8, %p208_p5 }
  0x19   :  { %218 = shalt.err (!%p215_p9)
}
  0x1a   :  { %43 = dma.hbm_to_vmem [thread:$0]  %s292_s2, 256, %s38_s23, [#allocation8], %s249_s18, %s249_s18, %s250_s19  }
  0x1b   :  { %239 = dma.done.wait [#allocation5], 16  }
  0x1c   :  { %240 = vsyncadd [#allocation5], 4294967280 }
  0x1d   :  { %241 = dma.done.wait [#allocation3], 256  }
  0x1e   :  { %242 = vsyncadd [#allocation3], 4294967040 }
  0x1f   :  { %243 = dma.done.wait [#allocation8], 256  }
  0x20   :  { %244 = vsyncadd [#allocation8], 4294967040 }
  0x21   :  { %53 = sfence }
  0x22   :  { %s54_s1 = sld [smem:[#allocation2]]  ;;  %v62_v0 = vld [vmem:[#allocation6] sm:$0xff]  ;;  %v63_v1 = vld [vmem:[#allocation6 + $0x8] sm:$0xff]  ;;  %v64_v2 = vld [vmem:[#allocation7] sm:$0xff]  ;;  %vm79_vm0 = vcmask 1046528   ;;  %vm112_vm1 = vcmask 1045504  }
  0x23   :  { %s158_s26 = sld [smem:[#allocation2 + $0x1]]  ;;  %v65_v3 = vld [vmem:[#allocation7 + $0x8] sm:$0x7f]  ;;  %vm134_vm2 = vcmask 1040384   ;;  %vm136_vm3 = vcmask 1041408   ;;  %s252_s5 = smov [#allocation9]  }
  0x24   :  { %s159_s27 = sld [smem:[#allocation2 + $0x2]]  ;;  %s147_s6 = sshll.u32 %s252_s5, 4  ;;  %s148_s6 = int_to_ptr.vmem [resolvable:$true] %s147_s6 }
  0x25   :  { %s282_s28 = sld [smem:[#allocation2 + $0x3]]  ;;  %s219_s7 = scalar_lea.vmem %s148_s6, 64 }
  0x26   :  { %s163_s29 = sld [smem:[#allocation2 + $0x6]]  ;;  %p220_p10 = scmp.ne.s32.totalorder %s148_s6, %s219_s7 }
  0x27   :  { %s161_s30 = sld [smem:[#allocation2 + $0x4]]  ;;  %p224_p11 = scmp.lt.s32.totalorder %s148_s6, %s148_s6 }
  0x28   :  { %v66_v4 = vstv %s54_s1  ;;  %s162_s2 = sld [smem:[#allocation2 + $0x5]]  ;;  %p225_p12 = scmp.lt.s32.totalorder %s219_s7, %s219_s7 }
  0x29   :  { %v67_v5 = vmul.f32 %v66_v4, %v62_v0  ;;  %v68_v6 = vmul.f32 %v66_v4, %v63_v1  ;;  %v69_v7 = vstv %s158_s26  ;;  %s164_s4 = sld [smem:[#allocation2 + $0x7]] }
  0x2a   :  { %v70_v8 = vmul.f32 %v69_v7, %v64_v2  ;;  %v71_v9 = vmul.f32 %v69_v7, %v65_v3  ;;  %v74_v10 = vstv %s159_s27  ;;  %p226_p13 = por %p225_p12, %p224_p11 }
  0x2b   :  { %v75_v11 = vmul.f32 %v74_v10, %v62_v0  ;;  %v76_v12 = vmul.f32 %v74_v10, %v63_v1  ;;  %v92_v23 = vstv %s282_s28 }
  0x2c   :  { %v72_v13 = vadd.f32 %v70_v8, %v67_v5  ;;  %v73_v14 = vadd.f32 %v71_v9, %v68_v6  ;;  %v87_v17 = vstv %s163_s29  ;;  %p227_p0 = pnand %p226_p13, %p220_p10 }
  0x2d   :  { %v80_v15 = vrot.slane %v75_v11, 1  ;;  %v81_v16 = vrot.slane %v76_v12, 1  ;;  %v95_v24 = vstv %s161_s30 }
  0x2e   :  { %v107_v25 = vstv %s162_s2 }
  0x2f   :  { %v82_v18 = vsel %vm79_vm0, %v80_v15, %v81_v16  ;;  %v86_v19 = vadd.f32 %v81_v16, %v73_v14  ;;  %v138_v50 = vstv %s164_s4 }
  0x30   :  { %v85_v20 = vadd.f32 %v82_v18, %v72_v13 }
  0x31   :  { %v89_v21 = vadd.f32 %v87_v17, %v86_v19 }
  0x32   :  { %v88_v22 = vadd.f32 %v87_v17, %v85_v20 }
  0x33   :  { %v91_v26 = vmax.f32 %v89_v21, 0.0 }
  0x34   :  { %v90_v27 = vmax.f32 %v88_v22, 0.0 }
  0x35   :  { %v94_v28 = vmul.f32 %v92_v23, %v91_v26  ;;  %v97_v29 = vmul.f32 %v95_v24, %v91_v26  ;;  %v109_v30 = vmul.f32 %v107_v25, %v91_v26 }
  0x36   :  { %v96_v31 = vmul.f32 %v95_v24, %v90_v27  ;;  %v108_v32 = vmul.f32 %v107_v25, %v90_v27  ;;  %v93_v33 = vmul.f32 %v92_v23, %v90_v27 }
  0x37   :  { %v101_v34 = vrot.slane %v97_v29, 1  ;;  %v114_v35 = vrot.slane %v109_v30, 2 }
  0x38   :  { %v100_v36 = vrot.slane %v96_v31, 1  ;;  %v113_v37 = vrot.slane %v108_v32, 2 }
  0x39   :  { %v106_v38 = vadd.f32 %v101_v34, %v94_v28 }
  0x3a   :  { %v102_v39 = vsel %vm79_vm0, %v100_v36, %v101_v34  ;;  %v115_v40 = vsel %vm112_vm1, %v113_v37, %v114_v35 }
  0x3b   :  { %v105_v41 = vadd.f32 %v102_v39, %v93_v33  ;;  %v119_v42 = vadd.f32 %v114_v35, %v106_v38 }
  0x3d   :  { %v118_v43 = vadd.f32 %v115_v40, %v105_v41  ;;  %v125_v44 = vrot.slane %v119_v42, 2 }
  0x3f   :  { %v121_v45 = vrot.slane %v118_v43, 2  ;;  %v127_v46 = vmax.f32 %v119_v42, %v125_v44 }
  0x41   :  { %v123_v47 = vmax.f32 %v118_v43, %v121_v45  ;;  %v132_v48 = vrot.slane %v127_v46, 6 }
  0x43   :  { %v129_v49 = vrot.slane %v123_v47, 3 }
  0x45   :  { %v135_v51 = vsel %vm134_vm2, %v123_v47, %v129_v49 }
  0x46   :  { %v137_v52 = vsel %vm136_vm3, %v135_v51, %v132_v48 }
  0x47   :  { %v139_v53 = vadd.f32 %v138_v50, %v137_v52 }
  0x49   :  { %140 = vst [vmem:[#allocation9] sm:$0x7] %v139_v53 }
  0x4a   :  { %230 = shalt.err (!%p227_p0)
}
  0x4b   :  { %150 = dma.vmem_to_hbm [thread:$0]  %s148_s6, 64, %s293_s3, [#allocation4]  }
  0x4c   :  { %245 = dma.done.wait [#allocation4], 64  }
  0x4d   :  { %246 = vsyncadd [#allocation4], 4294967232 }
  0x4e   :  { %154 = vsyncpa [#allocation3], 1 }
  0x4f   :  { %155 = vsyncpa [#allocation8], 1 }
  0x50   :  { %156 = vsyncpa [#allocation4], 1 }
  0x51   :  { %157 = vsyncpa [#allocation5], 1 }

</bundles_post_ra>
